<compile_context>
chip_gen: v5e
topology: v5e:2x2
jax: 0.10.0
libtpu: 0.0.40
codegen_flags: <defaults>
</compile_context>

<pallas_src>
import functools

import jax
import jax.numpy as jnp
from jax.experimental import pallas as pl
from jax.experimental.pallas import tpu as pltpu

LANES = 128
NUM_CLASSES = 4
ALPHA = 0.25
GAMMA = 2.0


def _focal_loss_kernel(x_ref, t_ref, out_ref, *, num_classes, alpha, gamma):
    # x_ref  : VMEM f32/bf16 [br, 128]   packed logits
    # t_ref  : VMEM i32      [br, 128]   packed (repeated) integer targets
    # out_ref: VMEM f32      [1, 8, 128] per-tile lane-dense partial sums
    x = x_ref[...].astype(jnp.float32)                       # (br, 128)
    tgt = t_ref[...]                                         # (br, 128) int32
    br = x.shape[0]

    # class id of each packed element: flat_index % C == lane % C (C | 128)
    lane = jax.lax.broadcasted_iota(jnp.int32, x.shape, 1)
    class_ids = lane % num_classes
    is_hot = class_ids == tgt                                # one_hot as bool
    t = is_hot.astype(jnp.float32)

    # stable BCE-with-logits: relu(x) - x*t + log1p(exp(-|x|))
    e = jnp.exp(-jnp.abs(x))                                 # single exp
    bce = jnp.maximum(x, 0.0) - x * t + jnp.log1p(e)

    # pt = exp(-bce) computed algebraically (no second exp):
    #   exp(-bce) = exp(x*t - relu(x)) / (1 + e)
    #   exp(x*t - relu(x)) is 1 when sign(x) "matches" t, else e.
    pos = x >= 0.0
    sel = jnp.where(is_hot,
                    jnp.where(pos, 1.0, e),
                    jnp.where(pos, e, 1.0))
    pt = sel / (1.0 + e)

    at = jnp.where(is_hot, 1.0 - alpha, alpha)
    u = 1.0 - pt
    mod = u * u if gamma == 2.0 else u ** gamma              # gamma==2 fast path
    f = at * mod * bce                                       # (br, 128)

    # Reduce sublanes in groups of 8 -> dense (8, 128) block store
    # (no cross-lane XLU reduce, no masked partial stores).
    out_ref[...] = jnp.sum(f.reshape(br // 8, 8, LANES), axis=0)[None]


def weighted_focal_loss(logits, targets, *, alpha=ALPHA, gamma=GAMMA,
                        block_rows=512):
    """Pallas-backed WeightedFocalLoss.forward. Returns a scalar f32."""
    n, c = logits.shape
    assert LANES % c == 0, "lane-dense class-id trick requires num_classes | 128"

    flat_len = n * c
    rows = -(-flat_len // LANES)                   # ceil
    rows8 = -(-rows // 8) * 8                      # round up to sublane multiple
    br = min(block_rows, rows8)                    # block rows (multiple of 8)
    padded_rows = -(-rows // br) * br              # multiple of br
    num_tiles = padded_rows // br
    pad = padded_rows * LANES - flat_len

    # Lane-dense repack (contiguous reinterpret of HBM + tail padding).
    # Padding: logit=-100 / target=-1  =>  exact 0 contribution to the sum.
    x_flat = jnp.pad(logits.reshape(-1), (0, pad), constant_values=-100.0)
    t_flat = jnp.pad(jnp.repeat(targets.astype(jnp.int32), c), (0, pad),
                     constant_values=-1)
    x2 = x_flat.reshape(padded_rows, LANES)
    t2 = t_flat.reshape(padded_rows, LANES)
    # TODO(synk): targets could be shipped as int8 (or 4-per-int32 packed) to
    # cut HBM traffic further; kept int32 here for lowering simplicity.

    kernel = functools.partial(_focal_loss_kernel, num_classes=c,
                               alpha=float(alpha), gamma=float(gamma))

    partials = pl.pallas_call(
        kernel,
        out_shape=jax.ShapeDtypeStruct((num_tiles, 8, LANES), jnp.float32),
        grid=(num_tiles,),
        in_specs=[
            pl.BlockSpec((br, LANES), lambda i: (i, 0)),      # packed logits
            pl.BlockSpec((br, LANES), lambda i: (i, 0)),      # packed targets
        ],
        out_specs=pl.BlockSpec((1, 8, LANES), lambda i: (i, 0, 0)),
        compiler_params=pltpu.CompilerParams(
            dimension_semantics=("parallel",),
            vmem_limit_bytes=32 * 1024 * 1024,
        ),
    )(x2, t2)

    # Final reduction + mean over the TRUE number of elements (not the padding).
    return jnp.sum(partials) / flat_len


def _reference(logits, targets, num_classes, alpha=ALPHA, gamma=GAMMA):
    """Pure-JAX reference mirroring the PyTorch forward."""
    x = logits.astype(jnp.float32)
    t = jax.nn.one_hot(targets, num_classes, dtype=jnp.float32)
    bce = jnp.maximum(x, 0.0) - x * t + jnp.log1p(jnp.exp(-jnp.abs(x)))
    at = jnp.where(t > 0.5, 1.0 - alpha, alpha)
    pt = jnp.exp(-bce)
    return jnp.mean(at * (1.0 - pt) ** gamma * bce)


if __name__ == "__main__":
    key = jax.random.PRNGKey(0)
    k_logits, k_targets = jax.random.split(key)

    # Small shape consistent with the module: (batch, num_classes) logits.
    batch = 8
    logits = jax.random.normal(k_logits, (batch, NUM_CLASSES), dtype=jnp.float32)
    targets = jax.random.randint(k_targets, (batch,), 0, NUM_CLASSES,
                                 dtype=jnp.int32)

    loss = jax.block_until_ready(weighted_focal_loss(logits, targets))
    ref = jax.block_until_ready(_reference(logits, targets, NUM_CLASSES))
    assert jnp.allclose(loss, ref, rtol=1e-5, atol=1e-5), (loss, ref)

    # Larger shape to exercise multi-tile grid + padded remainder.
    k2a, k2b = jax.random.split(jax.random.PRNGKey(1))
    n2 = 20000
    logits2 = jax.random.normal(k2a, (n2, NUM_CLASSES), dtype=jnp.float32)
    targets2 = jax.random.randint(k2b, (n2,), 0, NUM_CLASSES, dtype=jnp.int32)
    loss2 = jax.block_until_ready(weighted_focal_loss(logits2, targets2))
    ref2 = jax.block_until_ready(_reference(logits2, targets2, NUM_CLASSES))
    assert jnp.allclose(loss2, ref2, rtol=1e-5, atol=1e-5), (loss2, ref2)

    print("KERNEL_OK")
</pallas_src>

<mosaic_0001>
module attributes {stable_mosaic.version = 11 : i64} {
  func.func @_focal_loss_kernel(%arg0: i32, %arg1: memref<8x128xf32, #tpu.memory_space<vmem>>, %arg2: memref<8x128xi32, #tpu.memory_space<vmem>>, %arg3: memref<1x8x128xf32, #tpu.memory_space<vmem>>) attributes {dimension_semantics = [#tpu.dimension_semantics<parallel>], iteration_bounds = array<i64: 1>, scalar_prefetch = 0 : i64, scratch_operands = 0 : i64, tpu.core_type = #tpu.core_type<tc>, window_params = [{transform_indices = @transform_0, window_bounds = array<i64: 8, 128>}, {transform_indices = @transform_1, window_bounds = array<i64: 8, 128>}, {transform_indices = @transform_2, window_bounds = array<i64: 1, 8, 128>}]} {
    %c0 = arith.constant 0 : index
    %c0_0 = arith.constant 0 : index
    %0 = vector.load %arg1[%c0, %c0_0] : memref<8x128xf32, #tpu.memory_space<vmem>>, vector<8x128xf32>
    %c0_1 = arith.constant 0 : index
    %c0_2 = arith.constant 0 : index
    %1 = vector.load %arg2[%c0_1, %c0_2] : memref<8x128xi32, #tpu.memory_space<vmem>>, vector<8x128xi32>
    %2 = tpu.iota {dimensions = array<i32: 1>} : vector<8x128xi32>
    %c4_i32 = arith.constant 4 : i32
    %c0_i32 = arith.constant 0 : i32
    %3 = arith.cmpi eq, %c4_i32, %c0_i32 : i32
    %c1_i32 = arith.constant 1 : i32
    %4 = arith.select %3, %c1_i32, %c4_i32 : i32
    %5 = vector.broadcast %4 : i32 to vector<8x128xi32>
    %6 = arith.remsi %2, %5 : vector<8x128xi32>
    %c0_i32_3 = arith.constant 0 : i32
    %7 = vector.broadcast %c0_i32_3 : i32 to vector<8x128xi32>
    %8 = arith.cmpi ne, %6, %7 : vector<8x128xi32>
    %c0_i32_4 = arith.constant 0 : i32
    %9 = vector.broadcast %c0_i32_4 : i32 to vector<8x128xi32>
    %10 = arith.cmpi slt, %6, %9 : vector<8x128xi32>
    %c0_i32_5 = arith.constant 0 : i32
    %11 = arith.cmpi slt, %4, %c0_i32_5 : i32
    %12 = vector.broadcast %11 : i1 to vector<8x128xi1>
    %13 = vector.broadcast %12 : vector<8x128xi1> to vector<8x128xi1>
    %14 = arith.xori %10, %13 : vector<8x128xi1>
    %15 = arith.andi %14, %8 : vector<8x128xi1>
    %16 = vector.broadcast %4 : i32 to vector<8x128xi32>
    %17 = arith.addi %6, %16 : vector<8x128xi32>
    %18 = arith.select %15, %17, %6 : vector<8x128xi1>, vector<8x128xi32>
    %19 = arith.cmpi eq, %18, %1 : vector<8x128xi32>
    %20 = arith.extui %19 : vector<8x128xi1> to vector<8x128xi32>
    %21 = arith.sitofp %20 : vector<8x128xi32> to vector<8x128xf32>
    %22 = math.absf %0 : vector<8x128xf32>
    %cst = arith.constant 0.000000e+00 : f32
    %23 = vector.broadcast %cst : f32 to vector<8x128xf32>
    %24 = arith.subf %23, %22 : vector<8x128xf32>
    %25 = math.exp %24 : vector<8x128xf32>
    %cst_6 = arith.constant 0.000000e+00 : f32
    %26 = vector.broadcast %cst_6 : f32 to vector<8x128xf32>
    %27 = arith.maximumf %0, %26 : vector<8x128xf32>
    %28 = arith.mulf %0, %21 : vector<8x128xf32>
    %29 = arith.subf %27, %28 : vector<8x128xf32>
    %30 = math.log1p %25 : vector<8x128xf32>
    %31 = arith.addf %29, %30 : vector<8x128xf32>
    %cst_7 = arith.constant 0.000000e+00 : f32
    %32 = vector.broadcast %cst_7 : f32 to vector<8x128xf32>
    %33 = arith.cmpf oge, %0, %32 : vector<8x128xf32>
    %cst_8 = arith.constant 1.000000e+00 : f32
    %34 = vector.broadcast %cst_8 : f32 to vector<8x128xf32>
    %35 = arith.select %33, %34, %25 : vector<8x128xi1>, vector<8x128xf32>
    %cst_9 = arith.constant 1.000000e+00 : f32
    %36 = vector.broadcast %cst_9 : f32 to vector<8x128xf32>
    %37 = arith.select %33, %25, %36 : vector<8x128xi1>, vector<8x128xf32>
    %38 = arith.select %19, %35, %37 : vector<8x128xi1>, vector<8x128xf32>
    %cst_10 = arith.constant 1.000000e+00 : f32
    %39 = vector.broadcast %cst_10 : f32 to vector<8x128xf32>
    %40 = arith.addf %39, %25 : vector<8x128xf32>
    %41 = arith.divf %38, %40 : vector<8x128xf32>
    %cst_11 = arith.constant 7.500000e-01 : f32
    %cst_12 = arith.constant 2.500000e-01 : f32
    %42 = vector.broadcast %cst_11 : f32 to vector<8x128xf32>
    %43 = vector.broadcast %cst_12 : f32 to vector<8x128xf32>
    %44 = arith.select %19, %42, %43 : vector<8x128xi1>, vector<8x128xf32>
    %cst_13 = arith.constant 1.000000e+00 : f32
    %45 = vector.broadcast %cst_13 : f32 to vector<8x128xf32>
    %46 = arith.subf %45, %41 : vector<8x128xf32>
    %47 = arith.mulf %46, %46 : vector<8x128xf32>
    %48 = arith.mulf %44, %47 : vector<8x128xf32>
    %49 = arith.mulf %48, %31 : vector<8x128xf32>
    %50 = vector.shape_cast %49 : vector<8x128xf32> to vector<1x8x128xf32>
    %cst_14 = arith.constant dense<0.000000e+00> : vector<8x128xf32>
    %51 = vector.multi_reduction <add>, %50, %cst_14 [0] : vector<1x8x128xf32> to vector<8x128xf32>
    %52 = vector.shape_cast %51 : vector<8x128xf32> to vector<1x8x128xf32>
    %c0_15 = arith.constant 0 : index
    %c0_16 = arith.constant 0 : index
    %c0_17 = arith.constant 0 : index
    %53 = vector.load %arg3[%c0_15, %c0_16, %c0_17] : memref<1x8x128xf32, #tpu.memory_space<vmem>>, vector<1x8x128xf32>
    tpu.vector_store %arg3[%c0_15, %c0_16, %c0_17], %52 {strides = array<i32>} : memref<1x8x128xf32, #tpu.memory_space<vmem>>, vector<1x8x128xf32>,
    return
  }
  func.func @transform_0(%arg0: i32) -> (i32, i32) {
    %c0_i32 = arith.constant 0 : i32
    %c0_i32_0 = arith.constant 0 : i32
    return %arg0, %c0_i32 : i32, i32
  }
  func.func @transform_1(%arg0: i32) -> (i32, i32) {
    %c0_i32 = arith.constant 0 : i32
    %c0_i32_0 = arith.constant 0 : i32
    return %arg0, %c0_i32 : i32, i32
  }
  func.func @transform_2(%arg0: i32) -> (i32, i32, i32) {
    %c0_i32 = arith.constant 0 : i32
    %c0_i32_0 = arith.constant 0 : i32
    %c0_i32_1 = arith.constant 0 : i32
    return %arg0, %c0_i32, %c0_i32_0 : i32, i32, i32
  }
}

</mosaic_0001>

<bundles_post_ra>
// kernel: tpu_custom_call.1
= control target key start
LH: loop header
LB: loop body
LE: loop exit
PB: predicated region body
PF: predicated region fallthrough
CT: control target
= control target key end

     0   :  { %7 = vsyncpa [#allocation3], 0  ;;  %s250_s0 = inlined_call_operand.hbm [shape: f32[8,128], index: 0, kind: input, shape index: {}]   ;;  %s251_s1 = inlined_call_operand.hbm [shape: s32[8,128], index: 1, kind: input, shape index: {}]   ;;  %s252_s2 = inlined_call_operand.hbm [shape: f32[1,8,128], index: 2, kind: output, shape index: {}]  }
   0x1   :  { %8 = vsyncpa [#allocation6], 0 }
   0x2   :  { %9 = vsyncpa [#allocation4], 0  ;;  %s15_s11 = sshll.u32 %s250_s0, 4  ;;  %s211_s12 = smov [#allocation2]   ;;  %s16_s11 = int_to_ptr.hbm [resolvable:$true] %s15_s11 }
   0x3   :  { %s17_s13 = sshll.u32 %s211_s12, 4  ;;  %s26_s16 = sshll.u32 %s251_s1, 4  ;;  %s18_s13 = int_to_ptr.vmem [resolvable:$true] %s17_s13  ;;  %s27_s16 = int_to_ptr.hbm [resolvable:$true] %s26_s16 }
   0x4   :  { %20 = dma.hbm_to_vmem [thread:$0]  %s16_s11, 128, %s18_s13, [#allocation3]  }
   0x5   :  { %s212_s17 = smov [#allocation5]  }
   0x6   :  { %s28_s18 = sshll.u32 %s212_s17, 4  ;;  %s29_s18 = int_to_ptr.vmem [resolvable:$true] %s28_s18 }
   0x7   :  { %31 = dma.hbm_to_vmem [thread:$0]  %s27_s16, 128, %s29_s18, [#allocation6]  }
   0x8   :  { %205 = dma.done.wait [#allocation3], 128  }
   0x9   :  { %206 = vsyncadd [#allocation3], 4294967168 }
   0xa   :  { %207 = dma.done.wait [#allocation6], 128  }
   0xb   :  { %208 = vsyncadd [#allocation6], 4294967168  ;;  %v40_v0 = vld [vmem:[#allocation2] sm:$0xff]  ;;  %v42_v5 = vlaneseq  ;;  %v41_v9 = vld [vmem:[#allocation5] sm:$0xff]  ;;  %v213_v17 = vmov 0.0   ;;  %v214_v38 = vmov 0.25  }
   0xc   :  { %v59_v1 = vand.u32 2147483647, %v40_v0  ;;  %vm76_vm1 = vcmp.ge.f32.partialorder %v40_v0, 0.0  ;;  %v63_v26 = vmax.f32 %v40_v0, 0.0  ;;  %s215_s0 = smov [#allocation7]   ;;  %s110_s21 = sshll.u32 %s252_s2, 4  ;;  %s111_s21 = int_to_ptr.hbm [resolvable:$true] %s110_s21 }
   0xd   :  { %v43_v7 = vand.u32 127, %v42_v5  ;;  %s108_s1 = sshll.u32 %s215_s0, 4  ;;  %s109_s1 = int_to_ptr.vmem [resolvable:$true] %s108_s1 }
   0xe   :  { %v60_v2 = vsub.f32 0.0, %v59_v1 }
   0xf   :  { %v48_v8 = vand.u32 3, %v43_v7 }
  0x10   :  { %v61_v3 = vmul.f32 1.442695, %v60_v2 }
  0x11   :  { %vm237_vm0 = vcmp.eq.s32.totalorder %v48_v8, %v41_v9 }
  0x12   :  { %127 = vpow2.f32 %v61_v3  ;;  %v121_v18 = vsel %vm237_vm0, 1.0, %v213_v17  ;;  %v96_v39 = vsel %vm237_vm0, 0.75, %v214_v38 }
  0x13   :  { %v64_v27 = vmul.f32 %v121_v18, %v40_v0 }
  0x15   :  { %v65_v34 = vsub.f32 %v63_v26, %v64_v27 }
  0x18   :  { %v128_v4 = vpop.eup %127 }
  0x19   :  { %v66_v6 = vadd.f32 1.0, %v128_v4  ;;  %v69_v11 = vmul.f32 -0.5, %v128_v4  ;;  %v72_v21 = vand.u32 2147483647, %v128_v4  ;;  %v77_v22 = vsel %vm76_vm1, 1.0, %v128_v4 }
  0x1a   :  { %v78_v23 = vsel %vm76_vm1, %v128_v4, 1.0 }
  0x1b   :  { %129 = vrcp.f32 %v66_v6  ;;  %v92_v14 = vand.u32 2147483648, %v66_v6  ;;  %vm86_vm2 = vweird.f32 %v66_v6  ;;  %v90_v16 = vand.u32 2147483647, %v66_v6 }
  0x1c   :  { %131 = vlog2.f32 %v66_v6  ;;  %v70_v19 = vadd.f32 1.0, %v69_v11  ;;  %v79_v31 = vsel %vm237_vm0, %v77_v22, %v78_v23  ;;  %vm73_vm6 = vcmp.lt.f32.partialorder %v72_v21, 0.0004427343 }
  0x1d   :  { %v93_v25 = vor.u32 1.1754944e-38, %v92_v14  ;;  %vm91_vm5 = vcmp.eq.f32.partialorder %v90_v16, 8.507059e+37 }
  0x1e   :  { %v71_v30 = vmul.f32 %v128_v4, %v70_v19 }
  0x21   :  { %v130_v10 = vpop.eup %129 }
  0x22   :  { %v82_v12 = vmul.f32 %v130_v10, %v66_v6  ;;  %vm87_vm3 = vweird.f32 %v130_v10  ;;  %v132_v20 = vpop.eup %131 }
  0x23   :  { %vm88_vm4 = vmor %vm86_vm2, %vm87_vm3  ;;  %v68_v29 = vmul.f32 0.6931472, %v132_v20 }
  0x24   :  { %v83_v15 = vsub.f32 1.0, %v82_v12 }
  0x25   :  { %v74_v36 = vsel %vm73_vm6, %v71_v30, %v68_v29 }
  0x26   :  { %v84_v24 = vmul.f32 %v130_v10, %v83_v15  ;;  %v75_v40 = vadd.f32 %v74_v36, %v65_v34 }
  0x28   :  { %v85_v28 = vadd.f32 %v130_v10, %v84_v24 }
  0x2a   :  { %v89_v32 = vsel %vm88_vm4, %v130_v10, %v85_v28 }
  0x2b   :  { %v94_v33 = vsel %vm91_vm5, %v93_v25, %v89_v32 }
  0x2c   :  { %v95_v35 = vmul.f32 %v94_v33, %v79_v31 }
  0x2e   :  { %v97_v37 = vsub.f32 1.0, %v95_v35 }
  0x30   :  { %v98_v41 = vmul.f32 %v97_v37, %v97_v37 }
  0x32   :  { %v99_v42 = vmul.f32 %v98_v41, %v96_v39 }
  0x34   :  { %v100_v43 = vmul.f32 %v99_v42, %v75_v40 }
  0x36   :  { %102 = vst [vmem:[#allocation7] sm:$0xff] %v100_v43 }
  0x37   :  { %113 = dma.vmem_to_hbm [thread:$0]  %s109_s1, 128, %s111_s21, [#allocation4]  }
  0x38   :  { %209 = dma.done.wait [#allocation4], 128  }
  0x39   :  { %210 = vsyncadd [#allocation4], 4294967168 }
  0x3a   :  { %118 = vsyncpa [#allocation3], 1 }
  0x3b   :  { %119 = vsyncpa [#allocation6], 1 }
  0x3c   :  { %120 = vsyncpa [#allocation4], 1 }

</bundles_post_ra>
